<compile_context>
chip_gen: v6e
topology: v6e:2x2x1
jax: 0.10.0
libtpu: 0.0.40
codegen_flags: <defaults>
</compile_context>

<pallas_src>
import jax
import jax.numpy as jnp
import numpy as np
from jax.experimental import pallas as pl
from jax.experimental.pallas import tpu as pltpu

# --------------------------- synthetic config ------------------------------
NUM_EXPERTS = 4              # config.moe_num_experts
TOP_K = 2                    # config.moe_num_experts_per_tok
N_EMBD = 32                  # config.n_embd
HIDDEN = 4 * N_EMBD          # expert MLP hidden width (128 = one lane tile)
E1 = NUM_EXPERTS + 1         # real experts + DummyExpert column
EH = NUM_EXPERTS * HIDDEN    # stacked hidden width (512)
TOKEN_TILE = 512             # tokens per grid step (keeps grid >= 2 for v7x's
                             # two TensorCores once N >= 1024)


# --------------------------- shared math helpers ----------------------------
def _softmax_probs(logits):
    """f32 softmax over the expert columns (softmax_topk order)."""
    mx = jnp.max(logits, axis=-1, keepdims=True)
    ex = jnp.exp(logits - mx)
    return ex / jnp.sum(ex, axis=-1, keepdims=True)


def _topk_gates_sel(probs, with_sel):
    """Iterative top-k (lowest index wins ties). Returns dense per-expert
    combine gates and (optionally) the selected expert indices."""
    col = jax.lax.broadcasted_iota(jnp.int32, probs.shape, 1)
    remaining = probs
    gates = jnp.zeros_like(probs)
    sels = []
    for _ in range(TOP_K):                                     # static unroll
        rmax = jnp.max(remaining, axis=-1, keepdims=True)
        idx = jnp.min(jnp.where(remaining == rmax, col, E1),
                      axis=-1, keepdims=True)                  # (n, 1) int32
        onehot = col == idx
        gates = gates + jnp.where(onehot, probs, 0.0)
        if with_sel:
            sels.append(idx)
        remaining = jnp.where(onehot, -jnp.inf, remaining)
    sel = jnp.concatenate(sels, axis=1) if with_sel else None
    return gates, sel


def _bf16_elementwise_default():
    """bf16 VPU/EUP path only on v6e / v7x; f32 elsewhere (v5e-safe)."""
    try:
        kind = jax.devices()[0].device_kind.lower()
    except Exception:
        return False
    return any(tag in kind for tag in ("v6", "v7", "7x"))


# ------------------------------ fused kernel --------------------------------
def _make_moe_kernel(bf16_elementwise):
    def moe_fused_kernel(x_ref, wr_ref, w1_ref, b1_ref, w2_ref, b2_ref,
                         out_ref, logits_ref):
        """Masked router -> softmax -> top-k gates -> dense stacked expert
        MLPs -> gated combine. Gates never leave VMEM."""
        x = x_ref[...]                                          # (tn, D) bf16

        # -- router (mask already folded into wr) -----------------------------
        logits = jnp.dot(x, wr_ref[...], preferred_element_type=jnp.float32)
        logits_ref[...] = logits                                # (tn, E1) f32

        probs = _softmax_probs(logits)                          # f32
        gates, _ = _topk_gates_sel(probs, with_sel=False)       # (tn, E1) f32

        # -- all real experts as two wide GEMMs --------------------------------
        h = jnp.dot(x, w1_ref[...],
                    preferred_element_type=jnp.float32) + b1_ref[...]
        if bf16_elementwise:                                    # v6e/v7x only
            h = h.astype(jnp.bfloat16)
        h = jax.nn.gelu(h, approximate=True)                    # (tn, E*H)

        # per-expert gate broadcast via 128-aligned lane slices (layout-free);
        # the dummy expert's gate is simply never used -> zero contribution.
        g = gates.astype(h.dtype)
        parts = [h[:, e * HIDDEN:(e + 1) * HIDDEN] * g[:, e:e + 1]
                 for e in range(NUM_EXPERTS)]                   # static unroll
        gh = jnp.concatenate(parts, axis=1).astype(jnp.bfloat16)

        out = jnp.dot(gh, w2_ref[...], preferred_element_type=jnp.float32)
        out = out + jnp.dot(gates.astype(jnp.bfloat16), b2_ref[...],
                            preferred_element_type=jnp.float32)
        out_ref[...] = out.astype(out_ref.dtype)

    return moe_fused_kernel


# ------------------------------ wrapper --------------------------------------
def time_dependant_moe2_forward(x, masks, wr, w1, b1, w2, b2,
                                bf16_elementwise=None):
    """Pallas implementation of TimeDependantMoE2.forward."""
    if bf16_elementwise is None:
        bf16_elementwise = _bf16_elementwise_default()

    B, T, D = x.shape
    assert D == N_EMBD
    N = B * T
    xs = x.reshape(N, D)

    # one_hot_masks[:, :, masks.reshape(-1)] = 1  -> single shared (E,) mask;
    # append a constant-1 column for the DummyExpert; fold into router weight.
    mvec = jnp.zeros((NUM_EXPERTS,), jnp.float32).at[masks.reshape(-1)].set(1.0)
    mvec = jnp.concatenate([mvec, jnp.ones((1,), jnp.float32)])        # (E1,)
    wrm = (wr * mvec[None, :]).astype(jnp.bfloat16)                    # (D, E1)

    # stack expert weights for the two wide GEMMs (one-time reshapes)
    w1s = jnp.transpose(w1, (1, 0, 2)).reshape(D, EH).astype(jnp.bfloat16)
    b1s = b1.reshape(1, EH).astype(jnp.float32)
    w2s = w2.reshape(EH, D).astype(jnp.bfloat16)
    b2s = jnp.concatenate([b2.reshape(NUM_EXPERTS, D),
                           jnp.zeros((1, D), jnp.float32)],
                          axis=0).astype(jnp.bfloat16)                 # (E1, D)

    # pad token count to a tile multiple; skip the pad copy when not needed
    if N >= TOKEN_TILE:
        tile = TOKEN_TILE
    else:
        tile = -(-N // 16) * 16          # bf16 sublane pack = 16 rows
    n_pad = -(-N // tile) * tile
    xb = xs.astype(jnp.bfloat16)
    if n_pad != N:
        xb = jnp.zeros((n_pad, D), jnp.bfloat16).at[:N].set(xb)

    grid = (n_pad // tile,)
    out, logits = pl.pallas_call(
        _make_moe_kernel(bf16_elementwise),
        out_shape=(
            jax.ShapeDtypeStruct((n_pad, D), jnp.float32),     # combined output
            jax.ShapeDtypeStruct((n_pad, E1), jnp.float32),    # masked logits
        ),
        grid=grid,
        in_specs=[
            pl.BlockSpec((tile, D), lambda i: (i, 0)),         # x tile
            pl.BlockSpec((D, E1), lambda i: (0, 0)),           # masked router W
            pl.BlockSpec((D, EH), lambda i: (0, 0)),           # stacked W1
            pl.BlockSpec((1, EH), lambda i: (0, 0)),           # stacked b1
            pl.BlockSpec((EH, D), lambda i: (0, 0)),           # stacked W2
            pl.BlockSpec((E1, D), lambda i: (0, 0)),           # stacked b2
        ],
        out_specs=(
            pl.BlockSpec((tile, D), lambda i: (i, 0)),
            pl.BlockSpec((tile, E1), lambda i: (i, 0)),
        ),
        compiler_params=pltpu.CompilerParams(
            dimension_semantics=("parallel",)),
    )(xb, wrm, w1s, b1s, w2s, b2s)

    out = out[:N]
    logits = logits[:N]
    # selected_experts recomputed outside the kernel from the masked logits
    # (removes the TOP_K=2-lane masked stores; same tie-breaking as reference).
    _, sel = _topk_gates_sel(_softmax_probs(logits), with_sel=True)
    return out.reshape(B, T, D), {"router_logits": logits,
                                  "selected_experts": sel.astype(jnp.int32)}


# --------------------------- pure-JAX reference ------------------------------
def reference_forward(x, masks, wr, w1, b1, w2, b2, bf16_elementwise):
    """Per-expert-loop reference mirroring the kernel's precision policy
    (bf16 MXU inputs, f32 accumulation; bf16 elementwise only when enabled)."""
    B, T, D = x.shape
    xs = x.reshape(-1, D)
    mvec = jnp.zeros((NUM_EXPERTS,), jnp.float32).at[masks.reshape(-1)].set(1.0)
    mvec = jnp.concatenate([mvec, jnp.ones((1,), jnp.float32)])
    xb = xs.astype(jnp.bfloat16)
    wrb = (wr * mvec[None, :]).astype(jnp.bfloat16)
    logits = jnp.dot(xb, wrb, preferred_element_type=jnp.float32)
    probs = _softmax_probs(logits)
    gates, sel = _topk_gates_sel(probs, with_sel=True)

    results = jnp.zeros_like(xs)
    for e in range(NUM_EXPERTS):
        h = jnp.dot(xb, w1[e].astype(jnp.bfloat16),
                    preferred_element_type=jnp.float32) + b1[e, 0]
        if bf16_elementwise:
            h = h.astype(jnp.bfloat16)
        h = jax.nn.gelu(h, approximate=True)
        gh = (gates[:, e:e + 1].astype(h.dtype) * h).astype(jnp.bfloat16)
        results = results + jnp.dot(gh, w2[e].astype(jnp.bfloat16),
                                    preferred_element_type=jnp.float32)
    b2s = jnp.concatenate([b2.reshape(NUM_EXPERTS, D),
                           jnp.zeros((1, D), jnp.float32)], axis=0)
    results = results + jnp.dot(gates.astype(jnp.bfloat16),
                                b2s.astype(jnp.bfloat16),
                                preferred_element_type=jnp.float32)
    return results.reshape(B, T, D), logits, sel


# --------------------------------- main --------------------------------------
if __name__ == "__main__":
    B, T = 2, 8

    key = jax.random.PRNGKey(0)
    k_wr, k_w1, k_b1, k_w2, k_b2, k_x, k_m = jax.random.split(key, 7)

    wr = jax.random.normal(k_wr, (N_EMBD, E1), jnp.float32) * 0.1
    w1 = jax.random.normal(k_w1, (NUM_EXPERTS, N_EMBD, HIDDEN), jnp.float32) \
        * (1.0 / np.sqrt(N_EMBD))
    b1 = jax.random.normal(k_b1, (NUM_EXPERTS, 1, HIDDEN), jnp.float32) * 0.01
    w2 = jax.random.normal(k_w2, (NUM_EXPERTS, HIDDEN, N_EMBD), jnp.float32) \
        * (1.0 / np.sqrt(HIDDEN))
    b2 = jax.random.normal(k_b2, (NUM_EXPERTS, 1, N_EMBD), jnp.float32) * 0.01

    x = jax.random.normal(k_x, (B, T, N_EMBD), jnp.float32)
    # only experts {0, 1} appear in the time masks -> experts 2, 3 are masked
    masks = jax.random.randint(k_m, (B, T), 0, 2, dtype=jnp.int32)

    bf16_ew = _bf16_elementwise_default()
    out, aux = time_dependant_moe2_forward(x, masks, wr, w1, b1, w2, b2,
                                           bf16_elementwise=bf16_ew)
    out = jax.block_until_ready(out)
    aux = jax.tree_util.tree_map(jax.block_until_ready, aux)

    ref_out, ref_logits, ref_sel = reference_forward(
        x, masks, wr, w1, b1, w2, b2, bf16_elementwise=bf16_ew)
    np.testing.assert_allclose(np.asarray(out), np.asarray(ref_out),
                               rtol=2e-3, atol=2e-3)
    np.testing.assert_allclose(np.asarray(aux["router_logits"]),
                               np.asarray(ref_logits), rtol=1e-3, atol=1e-3)
    assert aux["selected_experts"].shape == (B * T, TOP_K)
    assert aux["selected_experts"].dtype == jnp.int32

    print("KERNEL_OK")
</pallas_src>

<mosaic_0001>
module attributes {stable_mosaic.version = 11 : i64} {
  func.func @moe_fused_kernel(%arg0: i32, %arg1: memref<16x32xbf16, #tpu.memory_space<vmem>>, %arg2: memref<32x5xbf16, #tpu.memory_space<vmem>>, %arg3: memref<32x512xbf16, #tpu.memory_space<vmem>>, %arg4: memref<1x512xf32, #tpu.memory_space<vmem>>, %arg5: memref<512x32xbf16, #tpu.memory_space<vmem>>, %arg6: memref<5x32xbf16, #tpu.memory_space<vmem>>, %arg7: memref<16x32xf32, #tpu.memory_space<vmem>>, %arg8: memref<16x5xf32, #tpu.memory_space<vmem>>) attributes {dimension_semantics = [#tpu.dimension_semantics<parallel>], iteration_bounds = array<i64: 1>, scalar_prefetch = 0 : i64, scratch_operands = 0 : i64, tpu.core_type = #tpu.core_type<tc>, window_params = [{transform_indices = @transform_0, window_bounds = array<i64: 16, 32>}, {pipeline_mode = #tpu.pipeline_mode<synchronous>, transform_indices = @transform_1, window_bounds = array<i64: 32, 5>}, {pipeline_mode = #tpu.pipeline_mode<synchronous>, transform_indices = @transform_2, window_bounds = array<i64: 32, 512>}, {pipeline_mode = #tpu.pipeline_mode<synchronous>, transform_indices = @transform_3, window_bounds = array<i64: 1, 512>}, {pipeline_mode = #tpu.pipeline_mode<synchronous>, transform_indices = @transform_4, window_bounds = array<i64: 512, 32>}, {pipeline_mode = #tpu.pipeline_mode<synchronous>, transform_indices = @transform_5, window_bounds = array<i64: 5, 32>}, {transform_indices = @transform_6, window_bounds = array<i64: 16, 32>}, {transform_indices = @transform_7, window_bounds = array<i64: 16, 5>}]} {
    %c0 = arith.constant 0 : index
    %c0_0 = arith.constant 0 : index
    %0 = vector.load %arg1[%c0, %c0_0] : memref<16x32xbf16, #tpu.memory_space<vmem>>, vector<16x32xbf16>
    %c0_1 = arith.constant 0 : index
    %c0_2 = arith.constant 0 : index
    %1 = vector.load %arg2[%c0_1, %c0_2] : memref<32x5xbf16, #tpu.memory_space<vmem>>, vector<32x5xbf16>
    %cst = arith.constant dense<0.000000e+00> : vector<16x5xf32>
    %2 = tpu.matmul %0, %1, %cst {dimension_numbers = #tpu.dot_dimension_numbers<[1], [0], [0], [1], [0, 0, 1, 1], [], []>} : vector<16x32xbf16>, vector<32x5xbf16>, vector<16x5xf32> -> vector<16x5xf32>
    %c0_3 = arith.constant 0 : index
    %c0_4 = arith.constant 0 : index
    %3 = vector.load %arg8[%c0_3, %c0_4] : memref<16x5xf32, #tpu.memory_space<vmem>>, vector<16x5xf32>
    tpu.vector_store %arg8[%c0_3, %c0_4], %2 {strides = array<i32>} : memref<16x5xf32, #tpu.memory_space<vmem>>, vector<16x5xf32>,
    %cst_5 = arith.constant dense<0xFF800000> : vector<16xf32>
    %4 = vector.multi_reduction <maximumf>, %2, %cst_5 [1] : vector<16x5xf32> to vector<16xf32>
    %5 = vector.shape_cast %4 : vector<16xf32> to vector<16x1xf32>
    %6 = vector.broadcast %5 : vector<16x1xf32> to vector<16x5xf32>
    %7 = arith.subf %2, %6 : vector<16x5xf32>
    %8 = math.exp %7 : vector<16x5xf32>
    %cst_6 = arith.constant dense<0.000000e+00> : vector<16xf32>
    %9 = vector.multi_reduction <add>, %8, %cst_6 [1] : vector<16x5xf32> to vector<16xf32>
    %10 = vector.shape_cast %9 : vector<16xf32> to vector<16x1xf32>
    %11 = vector.broadcast %10 : vector<16x1xf32> to vector<16x5xf32>
    %12 = arith.divf %8, %11 : vector<16x5xf32>
    %13 = tpu.iota {dimensions = array<i32: 1>} : vector<16x5xi32>
    %cst_7 = arith.constant 0.000000e+00 : f32
    %14 = vector.broadcast %cst_7 : f32 to vector<16x5xf32>
    %cst_8 = arith.constant dense<0xFF800000> : vector<16xf32>
    %15 = vector.multi_reduction <maximumf>, %12, %cst_8 [1] : vector<16x5xf32> to vector<16xf32>
    %16 = vector.shape_cast %15 : vector<16xf32> to vector<16x1xf32>
    %17 = vector.broadcast %16 : vector<16x1xf32> to vector<16x5xf32>
    %18 = arith.cmpf oeq, %12, %17 : vector<16x5xf32>
    %c5_i32 = arith.constant 5 : i32
    %19 = vector.broadcast %c5_i32 : i32 to vector<16x5xi32>
    %20 = arith.select %18, %13, %19 : vector<16x5xi1>, vector<16x5xi32>
    %cst_9 = arith.constant dense<2147483647> : vector<16xi32>
    %21 = vector.multi_reduction <minsi>, %20, %cst_9 [1] : vector<16x5xi32> to vector<16xi32>
    %22 = vector.shape_cast %21 : vector<16xi32> to vector<16x1xi32>
    %23 = vector.broadcast %22 : vector<16x1xi32> to vector<16x5xi32>
    %24 = arith.cmpi eq, %13, %23 : vector<16x5xi32>
    %cst_10 = arith.constant 0.000000e+00 : f32
    %25 = vector.broadcast %cst_10 : f32 to vector<16x5xf32>
    %26 = arith.select %24, %12, %25 : vector<16x5xi1>, vector<16x5xf32>
    %27 = arith.addf %14, %26 : vector<16x5xf32>
    %cst_11 = arith.constant 0xFF800000 : f32
    %28 = vector.broadcast %cst_11 : f32 to vector<16x5xf32>
    %29 = arith.select %24, %28, %12 : vector<16x5xi1>, vector<16x5xf32>
    %cst_12 = arith.constant dense<0xFF800000> : vector<16xf32>
    %30 = vector.multi_reduction <maximumf>, %29, %cst_12 [1] : vector<16x5xf32> to vector<16xf32>
    %31 = vector.shape_cast %30 : vector<16xf32> to vector<16x1xf32>
    %32 = vector.broadcast %31 : vector<16x1xf32> to vector<16x5xf32>
    %33 = arith.cmpf oeq, %29, %32 : vector<16x5xf32>
    %c5_i32_13 = arith.constant 5 : i32
    %34 = vector.broadcast %c5_i32_13 : i32 to vector<16x5xi32>
    %35 = arith.select %33, %13, %34 : vector<16x5xi1>, vector<16x5xi32>
    %cst_14 = arith.constant dense<2147483647> : vector<16xi32>
    %36 = vector.multi_reduction <minsi>, %35, %cst_14 [1] : vector<16x5xi32> to vector<16xi32>
    %37 = vector.shape_cast %36 : vector<16xi32> to vector<16x1xi32>
    %38 = vector.broadcast %37 : vector<16x1xi32> to vector<16x5xi32>
    %39 = arith.cmpi eq, %13, %38 : vector<16x5xi32>
    %cst_15 = arith.constant 0.000000e+00 : f32
    %40 = vector.broadcast %cst_15 : f32 to vector<16x5xf32>
    %41 = arith.select %39, %12, %40 : vector<16x5xi1>, vector<16x5xf32>
    %42 = arith.addf %27, %41 : vector<16x5xf32>
    %c0_16 = arith.constant 0 : index
    %c0_17 = arith.constant 0 : index
    %43 = vector.load %arg3[%c0_16, %c0_17] : memref<32x512xbf16, #tpu.memory_space<vmem>>, vector<32x512xbf16>
    %cst_18 = arith.constant dense<0.000000e+00> : vector<16x512xf32>
    %44 = tpu.matmul %0, %43, %cst_18 {dimension_numbers = #tpu.dot_dimension_numbers<[1], [0], [0], [1], [0, 0, 1, 1], [], []>} : vector<16x32xbf16>, vector<32x512xbf16>, vector<16x512xf32> -> vector<16x512xf32>
    %c0_19 = arith.constant 0 : index
    %c0_20 = arith.constant 0 : index
    %45 = vector.load %arg4[%c0_19, %c0_20] : memref<1x512xf32, #tpu.memory_space<vmem>>, vector<1x512xf32>
    %46 = vector.broadcast %45 : vector<1x512xf32> to vector<16x512xf32>
    %47 = arith.addf %44, %46 : vector<16x512xf32>
    %48 = arith.mulf %47, %47 : vector<16x512xf32>
    %49 = arith.mulf %47, %48 : vector<16x512xf32>
    %cst_21 = arith.constant 4.471500e-02 : f32
    %50 = vector.broadcast %cst_21 : f32 to vector<16x512xf32>
    %51 = arith.mulf %50, %49 : vector<16x512xf32>
    %52 = arith.addf %47, %51 : vector<16x512xf32>
    %cst_22 = arith.constant 0.797884583 : f32
    %53 = vector.broadcast %cst_22 : f32 to vector<16x512xf32>
    %54 = arith.mulf %53, %52 : vector<16x512xf32>
    %55 = math.tanh %54 : vector<16x512xf32>
    %cst_23 = arith.constant 1.000000e+00 : f32
    %56 = vector.broadcast %cst_23 : f32 to vector<16x512xf32>
    %57 = arith.addf %56, %55 : vector<16x512xf32>
    %cst_24 = arith.constant 5.000000e-01 : f32
    %58 = vector.broadcast %cst_24 : f32 to vector<16x512xf32>
    %59 = arith.mulf %58, %57 : vector<16x512xf32>
    %60 = arith.mulf %47, %59 : vector<16x512xf32>
    %61 = vector.extract_strided_slice %60 {offsets = [0, 0], sizes = [16, 128], strides = [1, 1]} : vector<16x512xf32> to vector<16x128xf32>
    %62 = vector.extract_strided_slice %42 {offsets = [0, 0], sizes = [16, 1], strides = [1, 1]} : vector<16x5xf32> to vector<16x1xf32>
    %63 = vector.broadcast %62 : vector<16x1xf32> to vector<16x128xf32>
    %64 = arith.mulf %61, %63 : vector<16x128xf32>
    %65 = vector.extract_strided_slice %60 {offsets = [0, 128], sizes = [16, 128], strides = [1, 1]} : vector<16x512xf32> to vector<16x128xf32>
    %66 = vector.extract_strided_slice %42 {offsets = [0, 1], sizes = [16, 1], strides = [1, 1]} : vector<16x5xf32> to vector<16x1xf32>
    %67 = vector.broadcast %66 : vector<16x1xf32> to vector<16x128xf32>
    %68 = arith.mulf %65, %67 : vector<16x128xf32>
    %69 = vector.extract_strided_slice %60 {offsets = [0, 256], sizes = [16, 128], strides = [1, 1]} : vector<16x512xf32> to vector<16x128xf32>
    %70 = vector.extract_strided_slice %42 {offsets = [0, 2], sizes = [16, 1], strides = [1, 1]} : vector<16x5xf32> to vector<16x1xf32>
    %71 = vector.broadcast %70 : vector<16x1xf32> to vector<16x128xf32>
    %72 = arith.mulf %69, %71 : vector<16x128xf32>
    %73 = vector.extract_strided_slice %60 {offsets = [0, 384], sizes = [16, 128], strides = [1, 1]} : vector<16x512xf32> to vector<16x128xf32>
    %74 = vector.extract_strided_slice %42 {offsets = [0, 3], sizes = [16, 1], strides = [1, 1]} : vector<16x5xf32> to vector<16x1xf32>
    %75 = vector.broadcast %74 : vector<16x1xf32> to vector<16x128xf32>
    %76 = arith.mulf %73, %75 : vector<16x128xf32>
    %77 = tpu.concatenate %64, %68, %72, %76 in 1 : vector<16x128xf32>, vector<16x128xf32>, vector<16x128xf32>, vector<16x128xf32> -> vector<16x512xf32>
    %78 = arith.truncf %77 : vector<16x512xf32> to vector<16x512xbf16>
    %c0_25 = arith.constant 0 : index
    %c0_26 = arith.constant 0 : index
    %79 = vector.load %arg5[%c0_25, %c0_26] : memref<512x32xbf16, #tpu.memory_space<vmem>>, vector<512x32xbf16>
    %cst_27 = arith.constant dense<0.000000e+00> : vector<16x32xf32>
    %80 = tpu.matmul %78, %79, %cst_27 {dimension_numbers = #tpu.dot_dimension_numbers<[1], [0], [0], [1], [0, 0, 1, 1], [], []>} : vector<16x512xbf16>, vector<512x32xbf16>, vector<16x32xf32> -> vector<16x32xf32>
    %81 = arith.truncf %42 : vector<16x5xf32> to vector<16x5xbf16>
    %c0_28 = arith.constant 0 : index
    %c0_29 = arith.constant 0 : index
    %82 = vector.load %arg6[%c0_28, %c0_29] : memref<5x32xbf16, #tpu.memory_space<vmem>>, vector<5x32xbf16>
    %cst_30 = arith.constant dense<0.000000e+00> : vector<16x32xf32>
    %83 = tpu.matmul %81, %82, %cst_30 {dimension_numbers = #tpu.dot_dimension_numbers<[1], [0], [0], [1], [0, 0, 1, 1], [], []>} : vector<16x5xbf16>, vector<5x32xbf16>, vector<16x32xf32> -> vector<16x32xf32>
    %84 = arith.addf %80, %83 : vector<16x32xf32>
    %c0_31 = arith.constant 0 : index
    %c0_32 = arith.constant 0 : index
    %85 = vector.load %arg7[%c0_31, %c0_32] : memref<16x32xf32, #tpu.memory_space<vmem>>, vector<16x32xf32>
    tpu.vector_store %arg7[%c0_31, %c0_32], %84 {strides = array<i32>} : memref<16x32xf32, #tpu.memory_space<vmem>>, vector<16x32xf32>,
    return
  }
  func.func @transform_0(%arg0: i32) -> (i32, i32) {
    %c0_i32 = arith.constant 0 : i32
    %c0_i32_0 = arith.constant 0 : i32
    return %arg0, %c0_i32 : i32, i32
  }
  func.func @transform_1(%arg0: i32) -> (i32, i32) {
    %c0_i32 = arith.constant 0 : i32
    %c0_i32_0 = arith.constant 0 : i32
    %c0_i32_1 = arith.constant 0 : i32
    return %c0_i32, %c0_i32_0 : i32, i32
  }
  func.func @transform_2(%arg0: i32) -> (i32, i32) {
    %c0_i32 = arith.constant 0 : i32
    %c0_i32_0 = arith.constant 0 : i32
    %c0_i32_1 = arith.constant 0 : i32
    return %c0_i32, %c0_i32_0 : i32, i32
  }
  func.func @transform_3(%arg0: i32) -> (i32, i32) {
    %c0_i32 = arith.constant 0 : i32
    %c0_i32_0 = arith.constant 0 : i32
    %c0_i32_1 = arith.constant 0 : i32
    return %c0_i32, %c0_i32_0 : i32, i32
  }
  func.func @transform_4(%arg0: i32) -> (i32, i32) {
    %c0_i32 = arith.constant 0 : i32
    %c0_i32_0 = arith.constant 0 : i32
    %c0_i32_1 = arith.constant 0 : i32
    return %c0_i32, %c0_i32_0 : i32, i32
  }
  func.func @transform_5(%arg0: i32) -> (i32, i32) {
    %c0_i32 = arith.constant 0 : i32
    %c0_i32_0 = arith.constant 0 : i32
    %c0_i32_1 = arith.constant 0 : i32
    return %c0_i32, %c0_i32_0 : i32, i32
  }
  func.func @transform_6(%arg0: i32) -> (i32, i32) {
    %c0_i32 = arith.constant 0 : i32
    %c0_i32_0 = arith.constant 0 : i32
    return %arg0, %c0_i32 : i32, i32
  }
  func.func @transform_7(%arg0: i32) -> (i32, i32) {
    %c0_i32 = arith.constant 0 : i32
    %c0_i32_0 = arith.constant 0 : i32
    return %arg0, %c0_i32 : i32, i32
  }
}

</mosaic_0001>

<bundles_post_ra>
// kernel: tpu_custom_call.1
= control target key start
LH: loop header
LB: loop body
LE: loop exit
PB: predicated region body
PF: predicated region fallthrough
CT: control target
= control target key end

     0   :  { %v1125_v1 = vmov 0.0   ;;  %vm1126_vm0 = vmmov 0   ;;  %vm50_vm1 = vcmask 261120   ;;  %s1457_s0 = inlined_call_operand.vmem [shape: bf16[16,32], index: 0, kind: input, shape index: {}]   ;;  %s1458_s1 = inlined_call_operand.vmem [shape: bf16[32,5], index: 1, kind: input, shape index: {}]   ;;  %s1459_s2 = inlined_call_operand.vmem [shape: bf16[32,512], index: 2, kind: input, shape index: {}]   ;;  %s1460_s3 = inlined_call_operand.vmem [shape: f32[1,512], index: 3, kind: input, shape index: {}]   ;;  %s1461_s4 = inlined_call_operand.vmem [shape: bf16[512,32], index: 4, kind: input, shape index: {}]   ;;  %s1462_s5 = inlined_call_operand.vmem [shape: bf16[5,32], index: 5, kind: input, shape index: {}]   ;;  %s1463_s6 = inlined_call_operand.hbm [shape: f32[16,32], index: 6, kind: output, shape index: {0}]   ;;  %s1464_s7 = inlined_call_operand.vmem [shape: f32[16,5], index: 7, kind: output, shape index: {1}]  }
   0x1   :  { %v1032_v0 = vld [vmem:[%s1458_s1 + $0x8] sm:$0xff]   ;;  %999 = vmatprep.subr.bf16.mxu0 %v1125_v1  ;;  %v1033_v2 = vld [vmem:[%s1458_s1] sm:$0xff]   ;;  %1003 = vmatprep.mubr.msk.bf16.mxu0 %vm1126_vm0, %v1125_v1 }
   0x2   :  { %1000 = vmatpush3.bf16.msra.mxu0 %v1032_v0  ;;  %v1188_v3 = vld [vmem:[%s1457_s0] sm:$0xff]  }
   0x3   :  { %1001 = vmatprep.subr.bf16.mxu0 %v1125_v1 }
   0x6   :  { %1002 = vmatpush3.bf16.msra.mxu0 %v1033_v2 }
   0x9   :  { %1004 = vmatmul.mubr.msk.bf16.vlgmr.msra.gmra.mxu0 %vm50_vm1, %v1188_v3 }
   0xa   :  { %13 = vsyncpa [#allocation3], 0  ;;  %vm95_vm2 = vcmask 39936   ;;  %v120_v28 = vlaneseq  ;;  %vm559_vm13 = vcmask 1041408   ;;  %vm560_vm14 = vcmask 1042432  }
   0xc   :  { %v1213_v29 = vand.u32 127, %v120_v28 }
  0xc9   :  { %v88_v4 = vpop.f32.mrf.mxu0 }
  0xca   :  { %96 = vst.msk [vmem:[%s1464_s7] sm:$0xff] %vm95_vm2, %v88_v4  ;;  %v98_v5 = vsel %vm95_vm2, %v88_v4, -inf }
  0xcb   :  { %99 = vmax.xlane.f32.xlu0 %v98_v5  ;;  %v1005_v6 = vpop.f32.mrf.mxu0 }
  0xcd   :  { %v91_v7 = vpop.f32.mrf.mxu0 }
  0xce   :  { %97 = vst.msk [vmem:[%s1464_s7 + $0x8] sm:$0xff] %vm95_vm2, %v91_v7  ;;  %v101_v8 = vsel %vm95_vm2, %v91_v7, -inf }
  0xcf   :  { %102 = vmax.xlane.f32.xlu0 %v101_v8  ;;  %v1006_v9 = vpop.f32.mrf.mxu0 }
 0x154   :  { %v100_v10 = vpop.xlane.xlu0 %99 }
 0x155   :  { %v104_v11 = vsub.f32 %v88_v4, %v100_v10  ;;  %v1035_v10 = vld [vmem:[%s1459_s2 + $0x24] ss:$16 sps:$4 sm:$0xff]  }
 0x156   :  { %298 = vmatprep.subr.bf16.mxu1 %v1035_v10  ;;  %v1071_v10 = vld [vmem:[%s1461_s4 + $0x40] sm:$0xff]  }
 0x157   :  { %v106_v12 = vmul.f32 1.442695, %v104_v11  ;;  %v1037_v11 = vld [vmem:[%s1459_s2 + $0x20] ss:$16 sps:$4 sm:$0xff]  }
 0x158   :  { %v103_v13 = vpop.xlane.xlu0 %102  ;;  %299 = vmatpush1.bf16.msra.mxu1 %v1037_v11  ;;  %v1066_v11 = vld [vmem:[%s1461_s4 + $0xa0] sm:$0xff]  }
 0x159   :  { %1079 = vpow2.f32 %v106_v12  ;;  %v105_v14 = vsub.f32 %v91_v7, %v103_v13  ;;  %v1038_v12 = vld [vmem:[%s1459_s2 + $0x28] ss:$16 sps:$4 sm:$0xff]   ;;  %v1040_v13 = vld [vmem:[%s1459_s2 + $0x2c] ss:$16 sps:$4 sm:$0xff]  }
 0x15a   :  { %341 = vmatprep.subr.bf16.mxu0 %v1040_v13  ;;  %v1069_v13 = vld [vmem:[%s1461_s4 + $0xd8] sm:$0xff]  }
 0x15b   :  { %v108_v15 = vmul.f32 1.442695, %v105_v14  ;;  %v1041_v14 = vld [vmem:[%s1459_s2 + $0x4] ss:$16 sps:$4 sm:$0xff]   ;;  %342 = vmatpush1.bf16.msra.mxu0 %v1038_v12 }
 0x15c   :  { %300 = vmatprep.subr.bf16.mxu1 %v1041_v14  ;;  %v1072_v12 = vld [vmem:[%s1461_s4] sm:$0xff]   ;;  %v1070_v14 = vld [vmem:[%s1461_s4 + $0x98] sm:$0xff]  }
 0x15d   :  { %1081 = vpow2.f32 %v108_v15  ;;  %v1046_v15 = vld [vmem:[%s1459_s2 + $0xc] ss:$16 sps:$4 sm:$0xff]  }
 0x15e   :  { %343 = vmatprep.subr.bf16.mxu0 %v1046_v15  ;;  %v1073_v15 = vld [vmem:[%s1461_s4 + $0xd0] sm:$0xff]  }
 0x166   :  { %v1080_v16 = vpop.eup %1079 }
 0x167   :  { %v110_v17 = vsel %vm95_vm2, %v1080_v16, 0.0 }
 0x168   :  { %111 = vadd.xlane.f32.xlu1 %v110_v17  ;;  %v1044_v17 = vld [vmem:[%s1459_s2 + $0x8] ss:$16 sps:$4 sm:$0xff]  }
 0x169   :  { %344 = vmatpush1.bf16.msra.mxu0 %v1044_v17  ;;  %v1075_v17 = vld [vmem:[%s1461_s4 + $0xc8] sm:$0xff]  }
 0x16a   :  { %v1082_v18 = vpop.eup %1081 }
 0x16b   :  { %v113_v19 = vsel %vm95_vm2, %v1082_v18, 0.0 }
 0x16c   :  { %114 = vadd.xlane.f32.xlu1 %v113_v19 }
 0x1f1   :  { %v112_v20 = vpop.xlane.xlu1 %111 }
 0x1f2   :  { %1083 = vrcp.f32 %v112_v20 }
 0x1f5   :  { %v115_v21 = vpop.xlane.xlu1 %114 }
 0x1f6   :  { %1085 = vrcp.f32 %v115_v21 }
 0x1ff   :  { %v1084_v22 = vpop.eup %1083 }
 0x200   :  { %v1204_v23 = vmul.f32 %v1084_v22, %v1080_v16  ;;  %v1043_v16 = vld [vmem:[%s1459_s2] ss:$16 sps:$4 sm:$0xff]  }
 0x201   :  { %301 = vmatpush1.bf16.msra.mxu1 %v1043_v16  ;;  %v1074_v16 = vld [vmem:[%s1461_s4 + $0x90] sm:$0xff]  }
 0x202   :  { %v122_v24 = vsel %vm95_vm2, %v1204_v23, -inf  ;;  %1007 = vmatprep.subr.bf16.mxu1 %v1125_v1 }
 0x203   :  { %v1086_v25 = vpop.eup %1085  ;;  %123 = vmax.xlane.f32.xlu0 %v122_v24 }
 0x204   :  { %v1208_v26 = vmul.f32 %v1086_v25, %v1082_v18  ;;  %v1127_v18 = vmov 0  }
 0x205   :  { %318 = vmatprep.mubr.bf16.mxu1 %v1127_v18  ;;  %361 = vmatprep.mubr.bf16.mxu0 %v1127_v18 }
 0x206   :  { %v125_v27 = vsel %vm95_vm2, %v1208_v26, -inf  ;;  %1024 = vset.pattern.permute.xlu1 %v1127_v18  ;;  %915 = vmatmul.mubr.msk.bf16.vlgmr.msra.gmra.mxu1 %vm50_vm1, %v1188_v3 }
 0x207   :  { %126 = vmax.xlane.f32.xlu1 %v125_v27  ;;  %916 = vmatmul.mubr.msk.bf16.vlgmr.msra.gmra.mxu0 %vm50_vm1, %v1188_v3  ;;  %v1129_v3 = vmov 65535  }
 0x208   :  { %1009 = vmatprep.mubr.msk.bf16.mxu1 %vm1126_vm0, %v1125_v1  ;;  %v555_v1 = vld [vmem:[%s1462_s5] sm:$0x7] }
 0x28c   :  { %v124_v30 = vpop.xlane.xlu0 %123 }
 0x28d   :  { %vm128_vm3 = vcmp.eq.f32.partialorder %v1204_v23, %v124_v30 }
 0x28e   :  { %v130_v31 = vsel %vm128_vm3, %v1213_v29, 5 }
 0x28f   :  { %v132_v32 = vsel %vm95_vm2, %v130_v31, 2147483647  ;;  %v1128_v31 = vmov 1  }
 0x290   :  { %v127_v33 = vpop.xlane.xlu1 %126  ;;  %v134_v34 = vshra.s32 %v132_v32, 16  ;;  %v133_v40 = vand.u32 65535, %v132_v32  ;;  %1023 = vset.pattern.permute.xlu0 %v1128_v31  ;;  %v561_v32 = vsel %vm559_vm13, 4294967295, %v1129_v3 }
 0x291   :  { %vm129_vm4 = vcmp.eq.f32.partialorder %v1208_v26, %v127_v33  ;;  %v562_v33 = vsel %vm560_vm14, %v561_v32, 0 }
 0x292   :  { %v131_v35 = vsel %vm129_vm4, %v1213_v29, 5  ;;  %v136_v36 = vcvt.s32.f32 %v134_v34  ;;  %v135_v42 = vcvt.s32.f32 %v133_v40  ;;  %v564_v34 = vand.u32 %v562_v33, %v555_v1 }
 0x293   :  { %v147_v37 = vsel %vm95_vm2, %v131_v35, 2147483647  ;;  %v1047_v35 = vld [vmem:[%s1461_s4 + $0x78] sm:$0xff]  }
 0x294   :  { %137 = vmin.xlane.f32.xlu0 %v136_v36  ;;  %v149_v38 = vshra.s32 %v147_v37, 16  ;;  %v148_v43 = vand.u32 65535, %v147_v37  ;;  %1008 = vmatpush3.bf16.msra.mxu1 %v564_v34  ;;  %v1049_v37 = vld [vmem:[%s1461_s4 + $0x70] sm:$0xff]  }
 0x295   :  { %955 = vmatprep.subr.bf16.mxu0 %v1047_v35 }
 0x296   :  { %v151_v39 = vcvt.s32.f32 %v149_v38  ;;  %v150_v46 = vcvt.s32.f32 %v148_v43  ;;  %v1050_v38 = vld [vmem:[%s1461_s4 + $0x30] sm:$0xff]  }
 0x298   :  { %152 = vmin.xlane.f32.xlu1 %v151_v39 }
 0x2c7   :  { %v363_v3 = vpop.f32.mrf.mxu0 }
 0x2c9   :  { %v365_v34 = vpop.f32.mrf.mxu0 }
 0x31d   :  { %v138_v41 = vpop.xlane.xlu0 %137 }
 0x31e   :  { %vm139_vm5 = vcmp.eq.f32.partialorder %v136_v36, %v138_v41  ;;  %v144_v48 = vcvt.f32.s32 %v138_v41  ;;  %v1048_v36 = vld [vmem:[%s1461_s4 + $0x38] sm:$0xff]  }
 0x31f   :  { %v140_v44 = vsel %vm139_vm5, %v135_v42, inf  ;;  %956 = vmatpush3.bf16.msra.mxu0 %v1048_v36 }
 0x320   :  { %141 = vmin.xlane.f32.xlu0 %v140_v44  ;;  %v145_v50 = vshll.u32 %v144_v48, 16  ;;  %957 = vmatprep.subr.bf16.mxu0 %v1049_v37 }
 0x321   :  { %v153_v45 = vpop.xlane.xlu1 %152 }
 0x322   :  { %vm154_vm6 = vcmp.eq.f32.partialorder %v151_v39, %v153_v45  ;;  %v159_v51 = vcvt.f32.s32 %v153_v45  ;;  %v1051_v45 = vld [vmem:[%s1461_s4 + $0x68] sm:$0xff]  }
 0x323   :  { %v155_v47 = vsel %vm154_vm6, %v150_v46, inf  ;;  %958 = vmatpush3.bf16.msra.mxu0 %v1050_v38  ;;  %v367_v38 = vpop.f32.mrf.mxu0 }
 0x324   :  { %156 = vmin.xlane.f32.xlu1 %v155_v47  ;;  %v160_v55 = vshll.u32 %v159_v51, 16  ;;  %v1052_v47 = vld [vmem:[%s1461_s4 + $0x28] sm:$0xff]   ;;  %959 = vmatprep.subr.bf16.mxu0 %v1051_v45  ;;  %v1055_v51 = vld [vmem:[%s1461_s4 + $0x60] sm:$0xff]  }
 0x325   :  { %v369_v45 = vpop.f32.mrf.mxu0 }
 0x327   :  { %960 = vmatpush3.bf16.msra.mxu0 %v1052_v47 }
 0x328   :  { %961 = vmatprep.subr.bf16.mxu0 %v1055_v51 }
 0x3a9   :  { %v142_v49 = vpop.xlane.xlu0 %141 }
 0x3aa   :  { %v143_v52 = vcvt.f32.s32 %v142_v49 }
 0x3ac   :  { %v1221_v53 = vadd.s32 %v145_v50, %v143_v52  ;;  %v1053_v50 = vld [vmem:[%s1461_s4 + $0xf8] sm:$0xff]  }
 0x3ad   :  { %v157_v54 = vpop.xlane.xlu1 %156  ;;  %977 = vmatprep.subr.bf16.mxu1 %v1053_v50 }
 0x3ae   :  { %v158_v56 = vcvt.f32.s32 %v157_v54  ;;  %vm162_vm7 = vcmp.eq.s32.totalorder %v1213_v29, %v1221_v53 }
 0x3af   :  { %v168_v57 = vsel %vm162_vm7, -inf, %v1204_v23  ;;  %v164_v52 = vsel %vm162_vm7, %v1204_v23, 0.0 }
 0x3b0   :  { %v1229_v58 = vadd.s32 %v160_v55, %v158_v56  ;;  %v170_v59 = vsel %vm95_vm2, %v168_v57, -inf }
 0x3b1   :  { %171 = vmax.xlane.f32.xlu0 %v170_v59  ;;  %v1059_v59 = vld [vmem:[%s1461_s4 + $0x58] sm:$0xff]  }
 0x3b2   :  { %vm163_vm8 = vcmp.eq.s32.totalorder %v1213_v29, %v1229_v58  ;;  %v1063_v58 = vld [vmem:[%s1461_s4 + $0x50] sm:$0xff]  }
 0x3b3   :  { %v169_v60 = vsel %vm163_vm8, -inf, %v1208_v26  ;;  %v165_v53 = vsel %vm163_vm8, %v1208_v26, 0.0 }
 0x3b4   :  { %v173_v61 = vsel %vm95_vm2, %v169_v60, -inf }
 0x3b5   :  { %174 = vmax.xlane.f32.xlu1 %v173_v61 }
 0x43a   :  { %v172_v62 = vpop.xlane.xlu0 %171 }
 0x43b   :  { %vm176_vm9 = vcmp.eq.f32.partialorder %v168_v57, %v172_v62  ;;  %v1056_v57 = vld [vmem:[%s1461_s4 + $0x20] sm:$0xff]   ;;  %v1054_v62 = vld [vmem:[%s1461_s4 + $0xb8] sm:$0xff]  }
 0x43c   :  { %v178_v63 = vsel %vm176_vm9, %v1213_v29, 5  ;;  %962 = vmatpush3.bf16.msra.mxu0 %v1056_v57 }
 0x43d   :  { %v180_v0 = vsel %vm95_vm2, %v178_v63, 2147483647  ;;  %963 = vmatprep.subr.bf16.mxu0 %v1059_v59  ;;  %v1130_v63 = vmov 3  }
 0x43e   :  { %v175_v2 = vpop.xlane.xlu1 %174  ;;  %v182_v4 = vshra.s32 %v180_v0, 16  ;;  %v181_v19 = vand.u32 65535, %v180_v0  ;;  %v1064_v0 = vld [vmem:[%s1461_s4 + $0x10] sm:$0xff]  }
 0x43f   :  { %vm177_vm10 = vcmp.eq.f32.partialorder %v169_v60, %v175_v2  ;;  %v1060_v60 = vld [vmem:[%s1461_s4 + $0x18] sm:$0xff]   ;;  %v1058_v2 = vld [vmem:[%s1461_s4 + $0xb0] sm:$0xff]  }
 0x440   :  { %v179_v5 = vsel %vm177_vm10, %v1213_v29, 5  ;;  %v184_v6 = vcvt.s32.f32 %v182_v4  ;;  %v183_v21 = vcvt.s32.f32 %v181_v19  ;;  %964 = vmatpush3.bf16.msra.mxu0 %v1060_v60  ;;  %v1061_v4 = vld [vmem:[%s1461_s4 + $0xe8] sm:$0xff]   ;;  %v1077_v19 = vld [vmem:[%s1461_s4 + $0xc0] sm:$0xff]  }
 0x441   :  { %v195_v7 = vsel %vm95_vm2, %v179_v5, 2147483647  ;;  %965 = vmatprep.subr.bf16.mxu0 %v1063_v58  ;;  %v1131_v5 = vmov 2  }
 0x442   :  { %185 = vmin.xlane.f32.xlu0 %v184_v6  ;;  %v197_v8 = vshra.s32 %v195_v7, 16  ;;  %v196_v22 = vand.u32 65535, %v195_v7  ;;  %v1062_v7 = vld [vmem:[%s1461_s4 + $0xa8] sm:$0xff]  }
 0x444   :  { %v199_v9 = vcvt.s32.f32 %v197_v8  ;;  %v198_v27 = vcvt.s32.f32 %v196_v22  ;;  %966 = vmatpush3.bf16.msra.mxu0 %v1064_v0  ;;  %v1068_v8 = vld [vmem:[%s1461_s4 + $0x8] sm:$0xff]   ;;  %v227_v22 = vshrl.u32 %v120_v28, 7 }
 0x446   :  { %200 = vmin.xlane.f32.xlu1 %v199_v9  ;;  %v228_v32 = vsub.s32 0, %v227_v22  ;;  %v240_v37 = vsub.s32 3, %v227_v22 }
 0x4cb   :  { %v186_v20 = vpop.xlane.xlu0 %185 }
 0x4cc   :  { %vm187_vm11 = vcmp.eq.f32.partialorder %v184_v6, %v186_v20  ;;  %v192_v39 = vcvt.f32.s32 %v186_v20  ;;  %v1067_v6 = vld [vmem:[%s1461_s4 + $0x48] sm:$0xff]   ;;  %v1078_v20 = vld [vmem:[%s1461_s4 + $0x80] sm:$0xff]  }
 0x4cd   :  { %v188_v24 = vsel %vm187_vm11, %v183_v21, inf  ;;  %967 = vmatprep.subr.bf16.mxu0 %v1067_v6  ;;  %v320_v21 = vpop.f32.mrf.mxu1 }
 0x4ce   :  { %189 = vmin.xlane.f32.xlu0 %v188_v24  ;;  %v193_v41 = vshll.u32 %v192_v39, 16  ;;  %968 = vmatpush3.bf16.msra.mxu0 %v1068_v8 }
 0x4cf   :  { %v201_v25 = vpop.xlane.xlu1 %200  ;;  %969 = vmatprep.subr.bf16.mxu0 %v1071_v10  ;;  %v322_v24 = vpop.f32.mrf.mxu1 }
 0x4d0   :  { %vm202_vm12 = vcmp.eq.f32.partialorder %v199_v9, %v201_v25  ;;  %v207_v42 = vcvt.f32.s32 %v201_v25  ;;  %v1065_v9 = vld [vmem:[%s1461_s4 + $0xe0] sm:$0xff]   ;;  %v232_v25 = vsub.s32 1, %v227_v22 }
 0x4d1   :  { %v203_v30 = vsel %vm202_vm12, %v198_v27, inf  ;;  %v224_v27 = vld [vmem:[%s1460_s3] sm:$0xf]  ;;  %s1132_s3 = smov [#allocation2]  }
 0x4d2   :  { %204 = vmin.xlane.f32.xlu1 %v203_v30  ;;  %v208_v48 = vshll.u32 %v207_v42, 16  ;;  %970 = vmatpush3.bf16.msra.mxu0 %v1072_v12  ;;  %v324_v30 = vpop.f32.mrf.mxu1  ;;  %v229_v35 = vrot.slane %v224_v27, %v228_v32  ;;  %v241_v42 = vrot.slane %v224_v27, %v240_v37 }
 0x4d4   :  { %v326_v1 = vpop.f32.mrf.mxu1  ;;  %v1402_v39 = vadd.f32 %v320_v21, %v229_v35  ;;  %v1416_v51 = vadd.f32 %v369_v45, %v241_v42 }
 0x557   :  { %v190_v40 = vpop.xlane.xlu0 %189 }
 0x558   :  { %v191_v43 = vcvt.f32.s32 %v190_v40 }
 0x55a   :  { %v194_v44 = vadd.s32 %v193_v41, %v191_v43  ;;  %v1406_v41 = vadd.f32 %v324_v30, %v229_v35  ;;  %v236_v43 = vsub.s32 2, %v227_v22 }
 0x55b   :  { %v205_v46 = vpop.xlane.xlu1 %204 }
 0x55c   :  { %vm210_vm15 = vcmp.eq.s32.totalorder %v1213_v29, %v194_v44  ;;  %v206_v49 = vcvt.f32.s32 %v205_v46  ;;  %v372_v46 = vmul.f32 %v1402_v39, %v1402_v39  ;;  %v237_v50 = vrot.slane %v224_v27, %v236_v43 }
 0x55d   :  { %v212_v54 = vsel %vm210_vm15, %v1204_v23, 0.0 }
 0x55e   :  { %v214_v55 = vadd.f32 %v212_v54, %v164_v52  ;;  %v209_v56 = vadd.s32 %v208_v48, %v206_v49  ;;  %v376_v48 = vmul.f32 %v1406_v41, %v1406_v41  ;;  %v1414_v49 = vadd.f32 %v365_v34, %v241_v42 }
 0x55f   :  { %v380_v54 = vmul.f32 %v372_v46, %v1402_v39  ;;  %v1427_v60 = vadd.f32 %v367_v38, %v237_v50 }
 0x560   :  { %vm211_vm0 = vcmp.eq.s32.totalorder %v1213_v29, %v209_v56  ;;  %446 = vperm.xlu1 %1024, %v214_v55   ;;  %457 = vperm.xlu0 %1023, %v214_v55   ;;  %v384_v56 = vmul.f32 %v376_v48, %v1406_v41  ;;  %v375_v57 = vmul.f32 %v1414_v49, %v1414_v49 }
 0x561   :  { %v213_v23 = vsel %vm211_vm0, %v1208_v26, 0.0  ;;  %v1057_v26 = vld [vmem:[%s1461_s4 + $0xf0] sm:$0xff]   ;;  %v378_v0 = vmul.f32 %v1427_v60, %v1427_v60 }
 0x562   :  { %v215_v61 = vadd.f32 %v213_v23, %v165_v53  ;;  %v1422_v53 = vadd.f32 %v363_v3, %v237_v50  ;;  %v379_v23 = vmul.f32 %v1416_v51, %v1416_v51 }
 0x563   :  { %v386_v10 = vmul.f32 %v378_v0, %v1427_v60 }
 0x564   :  { %1025 = vset.pattern.permute.xlu1 %v1130_v63  ;;  %v554_v29 = vpack.c.bf16 %v215_v61, %v214_v55  ;;  %1031 = vset.pattern.permute.xlu0 %v1130_v63  ;;  %v387_v58 = vmul.f32 %v379_v23, %v1416_v51 }
 0x565   :  { %477 = vperm.xlu1 %1025, %v214_v55  }
 0x566   :  { %1010 = vmatmul.mubr.msk.bf16.vlgmr.msra.gmra.mxu1 %vm95_vm2, %v554_v29  ;;  %v383_v29 = vmul.f32 %v375_v57, %v1414_v49 }
 0x567   :  { %978 = vmatpush3.bf16.msra.mxu1 %v1054_v62 }
 0x568   :  { %979 = vmatprep.subr.bf16.mxu1 %v1057_v26  ;;  %v374_v26 = vmul.f32 %v1422_v53, %v1422_v53 }
 0x569   :  { %1026 = vset.pattern.permute.xlu1 %v1131_v5 }
 0x56a   :  { %467 = vperm.xlu1 %1026, %v214_v55   ;;  %v382_v8 = vmul.f32 %v374_v26, %v1422_v53 }
 0x56b   :  { %980 = vmatpush3.bf16.msra.mxu1 %v1058_v2 }
 0x56c   :  { %981 = vmatprep.subr.bf16.mxu1 %v1061_v4 }
 0x56e   :  { %1027 = vset.pattern.permute.xlu1 %v1128_v31  ;;  %v233_v31 = vrot.slane %v224_v27, %v232_v25 }
 0x56f   :  { %461 = vperm.xlu1 %1027, %v215_v61   ;;  %982 = vmatpush3.bf16.msra.mxu1 %v1062_v7  ;;  %v391_v7 = vmul.f32 0.044715, %v383_v29 }
 0x570   :  { %983 = vmatprep.subr.bf16.mxu1 %v1065_v9  ;;  %v1396_v33 = vadd.f32 %v322_v24, %v233_v31  ;;  %v1398_v36 = vadd.f32 %v326_v1, %v233_v31  ;;  %v395_v9 = vmul.f32 0.044715, %v387_v58 }
 0x571   :  { %v399_v12 = vadd.f32 %v391_v7, %v1414_v49 }
 0x572   :  { %v373_v28 = vmul.f32 %v1396_v33, %v1396_v33  ;;  %v377_v40 = vmul.f32 %v1398_v36, %v1398_v36 }
 0x573   :  { %1028 = vset.pattern.permute.xlu1 %v1127_v18  ;;  %984 = vmatpush3.bf16.msra.mxu1 %v1066_v11  ;;  %v1076_v18 = vld [vmem:[%s1461_s4 + $0x88] sm:$0xff]   ;;  %s888_s4 = sshll.u32 %s1132_s3, 4  ;;  %s889_s4 = int_to_ptr.vmem [resolvable:$true] %s888_s4 }
 0x574   :  { %451 = vperm.xlu1 %1028, %v215_v61   ;;  %985 = vmatprep.subr.bf16.mxu1 %v1069_v13  ;;  %v381_v44 = vmul.f32 %v373_v28, %v1396_v33  ;;  %v385_v47 = vmul.f32 %v377_v40, %v1398_v36  ;;  %s1103_s7 = scalar_lea.vmem %s889_s4, 256  ;;  %p1108_p1 = scmp.lt.s32.totalorder %s889_s4, %s889_s4 }
 0x575   :  { %p1104_p0 = scmp.ne.s32.totalorder %s889_s4, %s1103_s7  ;;  %p1109_p2 = scmp.lt.s32.totalorder %s1103_s7, %s1103_s7 }
 0x576   :  { %v389_v52 = vmul.f32 0.044715, %v381_v44  ;;  %v393_v55 = vmul.f32 0.044715, %v385_v47 }
 0x577   :  { %986 = vmatpush3.bf16.msra.mxu1 %v1070_v14  ;;  %v390_v14 = vmul.f32 0.044715, %v382_v8  ;;  %p1110_p3 = por %p1109_p2, %p1108_p1 }
 0x578   :  { %1029 = vset.pattern.permute.xlu1 %v1130_v63  ;;  %987 = vmatprep.subr.bf16.mxu1 %v1073_v15  ;;  %v397_v59 = vadd.f32 %v389_v52, %v1396_v33  ;;  %v401_v62 = vadd.f32 %v393_v55, %v1398_v36  ;;  %v392_v63 = vmul.f32 0.044715, %v384_v56  ;;  %v403_v15 = vadd.f32 %v395_v9, %v1416_v51 }
 0x579   :  { %481 = vperm.xlu1 %1029, %v215_v61   ;;  %p1111_p4 = pnand %p1110_p3, %p1104_p0 }
 0x57a   :  { %v405_v2 = vmul.f32 0.7978846, %v397_v59  ;;  %v400_v6 = vadd.f32 %v392_v63, %v1406_v41 }
 0x57b   :  { %988 = vmatpush3.bf16.msra.mxu1 %v1074_v16  ;;  %v394_v16 = vmul.f32 0.044715, %v386_v10 }
 0x57c   :  { %989 = vmatprep.subr.bf16.mxu1 %v1075_v17  ;;  %1087 = vtanh.f32 %v405_v2  ;;  %v408_v13 = vmul.f32 0.7978846, %v400_v6  ;;  %v407_v17 = vmul.f32 0.7978846, %v399_v12 }
 0x57d   :  { %1030 = vset.pattern.permute.xlu1 %v1131_v5  ;;  %v409_v5 = vmul.f32 0.7978846, %v401_v62 }
 0x57e   :  { %471 = vperm.xlu1 %1030, %v215_v61   ;;  %v388_v61 = vmul.f32 0.044715, %v380_v54 }
 0x57f   :  { %990 = vmatpush3.bf16.msra.mxu1 %v1076_v18  ;;  %1089 = vtanh.f32 %v409_v5  ;;  %v398_v18 = vadd.f32 %v390_v14, %v1422_v53 }
 0x580   :  { %991 = vmatprep.subr.bf16.mxu1 %v1077_v19  ;;  %v396_v4 = vadd.f32 %v388_v61, %v1402_v39  ;;  %v411_v19 = vmul.f32 0.7978846, %v403_v15 }
 0x581   :  { %v406_v22 = vmul.f32 0.7978846, %v398_v18 }
 0x582   :  { %v404_v11 = vmul.f32 0.7978846, %v396_v4 }
 0x583   :  { %992 = vmatpush3.bf16.msra.mxu1 %v1078_v20  ;;  %v402_v20 = vadd.f32 %v394_v16, %v1427_v60 }
 0x584   :  { %1091 = vtanh.f32 %v404_v11 }
 0x585   :  { %1093 = vtanh.f32 %v408_v13  ;;  %v410_v24 = vmul.f32 0.7978846, %v402_v20 }
 0x586   :  { %1095 = vtanh.f32 %v407_v17 }
 0x587   :  { %1097 = vtanh.f32 %v411_v19 }
 0x588   :  { %1099 = vtanh.f32 %v406_v22 }
 0x589   :  { %v1088_v25 = vpop.eup %1087  ;;  %1101 = vtanh.f32 %v410_v24 }
 0x58a   :  { %v421_v31 = vadd.f32 1.0, %v1088_v25 }
 0x58c   :  { %v1090_v27 = vpop.eup %1089  ;;  %v429_v34 = vmul.f32 0.5, %v421_v31 }
 0x58d   :  { %v425_v3 = vadd.f32 1.0, %v1090_v27 }
 0x58e   :  { %v437_v44 = vmul.f32 %v429_v34, %v1396_v33 }
 0x58f   :  { %v433_v37 = vmul.f32 0.5, %v425_v3 }
 0x591   :  { %v1092_v32 = vpop.eup %1091  ;;  %v441_v45 = vmul.f32 %v433_v37, %v1398_v36 }
 0x592   :  { %v1094_v1 = vpop.eup %1093  ;;  %v420_v28 = vadd.f32 1.0, %v1092_v32 }
 0x593   :  { %v424_v38 = vadd.f32 1.0, %v1094_v1  ;;  %v1096_v40 = vpop.eup %1095 }
 0x594   :  { %v1098_v42 = vpop.eup %1097  ;;  %v428_v46 = vmul.f32 0.5, %v420_v28  ;;  %v423_v52 = vadd.f32 1.0, %v1096_v40 }
 0x595   :  { %v432_v48 = vmul.f32 0.5, %v424_v38  ;;  %v427_v55 = vadd.f32 1.0, %v1098_v42  ;;  %v1100_v56 = vpop.eup %1099 }
 0x596   :  { %v1102_v57 = vpop.eup %1101  ;;  %v436_v59 = vmul.f32 %v428_v46, %v1402_v39  ;;  %v431_v62 = vmul.f32 0.5, %v423_v52  ;;  %v422_v36 = vadd.f32 1.0, %v1100_v56 }
 0x597   :  { %v440_v61 = vmul.f32 %v432_v48, %v1406_v41  ;;  %v435_v33 = vmul.f32 0.5, %v427_v55  ;;  %v426_v58 = vadd.f32 1.0, %v1102_v57 }
 0x598   :  { %v439_v2 = vmul.f32 %v431_v62, %v1414_v49  ;;  %v430_v5 = vmul.f32 0.5, %v422_v36 }
 0x599   :  { %v443_v4 = vmul.f32 %v435_v33, %v1416_v51  ;;  %v434_v7 = vmul.f32 0.5, %v426_v58 }
 0x59a   :  { %v438_v9 = vmul.f32 %v430_v5, %v1422_v53 }
 0x59b   :  { %v442_v10 = vmul.f32 %v434_v7, %v1427_v60 }
 0x5db   :  { %v447_v21 = vpop.permute.xlu1 %446  ;;  %v458_v43 = vpop.permute.xlu0 %457 }
 0x5dc   :  { %v464_v50 = vmul.f32 %v458_v43, %v437_v44  ;;  %v454_v29 = vmul.f32 %v447_v21, %v436_v59 }
 0x5e0   :  { %v478_v30 = vpop.permute.xlu1 %477 }
 0x5e1   :  { %v484_v39 = vmul.f32 %v478_v30, %v439_v2 }
 0x5e5   :  { %v468_v35 = vpop.permute.xlu1 %467 }
 0x5e6   :  { %v474_v12 = vmul.f32 %v468_v35, %v438_v9 }
 0x5ea   :  { %v462_v47 = vpop.permute.xlu1 %461 }
 0x5eb   :  { %v465_v54 = vmul.f32 %v462_v47, %v441_v45 }
 0x5ed   :  { %v487_v23 = vpack.c.bf16 %v465_v54, %v464_v50 }
 0x5ef   :  { %v452_v63 = vpop.permute.xlu1 %451  ;;  %831 = vmatprep.mubr.bf16.mxu0 %v487_v23 }
 0x5f0   :  { %v455_v26 = vmul.f32 %v452_v63, %v440_v61 }
 0x5f2   :  { %v486_v0 = vpack.c.bf16 %v455_v26, %v454_v29 }
 0x5f4   :  { %v482_v6 = vpop.permute.xlu1 %481  ;;  %832 = vmatmul.mubr.bf16.vlgmr.msra.gmra.mxu0 %v486_v0 }
 0x5f5   :  { %v485_v8 = vmul.f32 %v482_v6, %v443_v4 }
 0x5f7   :  { %v489_v41 = vpack.c.bf16 %v485_v8, %v484_v39 }
 0x5f9   :  { %v472_v11 = vpop.permute.xlu1 %471  ;;  %872 = vmatprep.mubr.bf16.mxu1 %v489_v41 }
 0x5fa   :  { %v475_v13 = vmul.f32 %v472_v11, %v442_v10 }
 0x5fc   :  { %v488_v14 = vpack.c.bf16 %v475_v13, %v474_v12 }
 0x5fe   :  { %873 = vmatmul.mubr.bf16.vlgmr.msra.gmra.mxu1 %v488_v14 }
 0x626   :  { %v600_v49 = vpop.f32.mrf.mxu1 }
 0x628   :  { %v1011_v15 = vpop.f32.mrf.mxu1 }
 0x62a   :  { %v603_v51 = vpop.f32.mrf.mxu1 }
 0x62c   :  { %v1012_v16 = vpop.f32.mrf.mxu1 }
 0x6b4   :  { %v971_v17 = vpop.f32.mrf.mxu0 }
 0x6b6   :  { %v972_v18 = vpop.f32.mrf.mxu0 }
 0x6b7   :  { %v973_v20 = vadd.f32 %v972_v18, %v971_v17 }
 0x6b8   :  { %v974_v19 = vpop.f32.mrf.mxu0 }
 0x6b9   :  { %v834_v53 = vadd.f32 %v973_v20, %v600_v49 }
 0x6ba   :  { %v975_v21 = vpop.f32.mrf.mxu0 }
 0x6bb   :  { %v976_v25 = vadd.f32 %v975_v21, %v974_v19 }
 0x6bd   :  { %v837_v3 = vadd.f32 %v976_v25, %v603_v51 }
 0x6be   :  { %v993_v22 = vpop.f32.mrf.mxu1 }
 0x6c0   :  { %v994_v24 = vpop.f32.mrf.mxu1 }
 0x6c1   :  { %v995_v60 = vadd.f32 %v994_v24, %v993_v22 }
 0x6c2   :  { %v996_v27 = vpop.f32.mrf.mxu1 }
 0x6c3   :  { %v875_v30 = vadd.f32 %v995_v60, %v834_v53 }
 0x6c4   :  { %v997_v31 = vpop.f32.mrf.mxu1 }
 0x6c5   :  { %881 = vst.msk [vmem:[#allocation2] sm:$0xff] %vm50_vm1, %v875_v30  ;;  %v998_v32 = vadd.f32 %v997_v31, %v996_v27 }
 0x6c7   :  { %v878_v1 = vadd.f32 %v998_v32, %v837_v3 }
 0x6c9   :  { %882 = vst.msk [vmem:[#allocation2 + $0x8] sm:$0xff] %vm50_vm1, %v878_v1 }
 0x6ca   :  { %1114 = shalt.err (!%p1111_p4)
}
 0x6cb   :  { %s1133_s9 = smov 128   ;;  %s1134_s10 = smov 8  }
 0x6cc   :  { %894 = dma.vmem_to_hbm [thread:$0]  %s889_s4, 256, %s1463_s6, [#allocation3], %s1133_s9, %s1133_s9, %s1134_s10  }
 0x6cd   :  { %1123 = dma.done.wait [#allocation3], 256  }
 0x6ce   :  { %1124 = vsyncadd [#allocation3], 4294967040 }
 0x6cf   :  { %902 = vsyncpa [#allocation3], 1 }

</bundles_post_ra>
